<compile_context>
chip_gen: v5e
topology: v5e:2x2
jax: 0.10.0
libtpu: 0.0.40
codegen_flags: <defaults>
</compile_context>

<pallas_src>
import jax
import jax.numpy as jnp
from jax.experimental import pallas as pl
from jax.experimental.pallas import tpu as pltpu


def _align8(n):
    return (n + 7) & ~7


def _round_up(n, m):
    return ((n + m - 1) // m) * m


def _cdiv(a, b):
    return -(-a // b)


def _slab_layout(d_model, hidden, out_rows):
    """Static, 8-aligned row offsets for the packed (transposed) parameter slab."""
    off, r = {}, 0
    for name, rows in (("w1T", d_model), ("b1", d_model),
                       ("w2T", d_model), ("b2", d_model),
                       ("wh1T", 2 * hidden), ("bh1", 2 * hidden),
                       ("wh2T", out_rows), ("bh2", out_rows)):
        off[name] = r
        r = _align8(r + rows)
    return off, r


def init_params(key, d_model=32, outputs=4):
    """PyTorch-style uniform(+-1/sqrt(fan_in)) init; weights stored (in, out)."""
    def linear(key, fan_in, fan_out):
        kw, kb = jax.random.split(key)
        bound = 1.0 / jnp.sqrt(float(fan_in))
        w = jax.random.uniform(kw, (fan_in, fan_out), jnp.float32, -bound, bound)
        b = jax.random.uniform(kb, (1, fan_out), jnp.float32, -bound, bound)
        return w, b

    keys = jax.random.split(key, 6)
    p = {}
    p['w1'],  p['b1']  = linear(keys[0], 3, d_model)
    p['w2'],  p['b2']  = linear(keys[1], d_model, d_model)
    p['wa1'], p['ba1'] = linear(keys[2], d_model, 16)
    p['wa2'], p['ba2'] = linear(keys[3], 16, outputs)
    p['wv1'], p['bv1'] = linear(keys[4], d_model, 16)
    p['wv2'], p['bv2'] = linear(keys[5], 16, 1)
    return p


def pack_params(params):
    """Fuse row-selection / 32-x[12] fix-up, the two heads and the dueling
    combine into the weights, transpose for feature-major compute, and pack
    everything into one f32 slab.  Run ONCE at init (not per forward)."""
    d_model = params['w1'].shape[1]
    hidden = params['wa1'].shape[1]
    A = params['wa2'].shape[1]
    out_rows = max(8, _align8(A))

    # --- Layer 1: kernel feeds raw state rows 8..15 (aligned 8-row block).
    # local row 1 = x[9], local 4 = x[12], local 5 = x[13]; x[12] -> 32 - x[12]
    # is affine so it folds into weight sign + bias.  Stored transposed (d, 8).
    w1T = jnp.zeros((d_model, 8), jnp.float32)
    w1T = w1T.at[:, 1].set(params['w1'][0, :])          # x[9]
    w1T = w1T.at[:, 4].set(-params['w1'][1, :])         # -x[12]
    w1T = w1T.at[:, 5].set(params['w1'][2, :])          # x[13]
    b1c = (params['b1'] + 32.0 * params['w1'][1:2, :]).T            # (d, 1)

    w2T = params['w2'].T                                            # (d, d)
    b2c = params['b2'].T                                            # (d, 1)

    # --- Head-1 fusion: [ad-hidden | val-hidden] -> one (2h, d) matmul.
    wh1T = jnp.concatenate([params['wa1'], params['wv1']], axis=1).T  # (2h, d)
    bh1c = jnp.concatenate([params['ba1'], params['bv1']], axis=1).T  # (2h, 1)

    # --- Head-2 + dueling fusion: ad - mean(ad) = ad @ C, C = I - 1/A;
    # val broadcast over actions -> replicate wv2 across the A outputs.
    C = jnp.eye(A, dtype=jnp.float32) - jnp.full((A, A), 1.0 / A, jnp.float32)
    wa2_c = params['wa2'] @ C                                       # (h, A)
    ba2_c = params['ba2'] @ C                                       # (1, A)
    wh2 = jnp.concatenate([wa2_c, jnp.tile(params['wv2'], (1, A))], axis=0)
    bh2 = ba2_c + params['bv2']                                     # (1, A)
    wh2T = jnp.zeros((out_rows, 2 * hidden), jnp.float32).at[:A, :].set(wh2.T)
    bh2c = jnp.zeros((out_rows, 1), jnp.float32).at[:A, :].set(bh2.T)

    off, rows = _slab_layout(d_model, hidden, out_rows)
    cols = max(8, d_model, 2 * hidden)
    slab = jnp.zeros((rows, cols), jnp.float32)

    def place(s, name, arr):
        r, c = arr.shape
        return s.at[off[name]:off[name] + r, 0:c].set(arr.astype(jnp.float32))

    for name, arr in (("w1T", w1T), ("b1", b1c), ("w2T", w2T), ("b2", b2c),
                      ("wh1T", wh1T), ("bh1", bh1c), ("wh2T", wh2T), ("bh2", bh2c)):
        slab = place(slab, name, arr)

    meta = dict(d_model=d_model, hidden=hidden, outputs=A, out_rows=out_rows,
                offsets=off, rows=rows, cols=cols)
    return slab, meta


def rl_forward(x, slab, meta, batch_tile=512):
    """x: (N_STATES, B) raw state tensor (N_STATES >= 14). Returns {'rl': (B, A)}."""
    x = x.astype(jnp.float32)
    n_states, B = x.shape
    A = meta['outputs']
    d_model = meta['d_model']
    hidden = meta['hidden']
    out_rows = meta['out_rows']
    off = meta['offsets']

    # Ensure the aligned 8-row block [8:16) (containing rows 9..13) exists.
    if n_states < 16:
        x = jnp.pad(x, ((0, 16 - n_states), (0, 0)))
        n_states = 16

    # Lane-aligned batch tile; keep >= 2 grid steps for large B so v7x's two
    # TensorCores both get work (harmless on v5e/v6e).
    if B <= 256:
        tile = _round_up(max(B, 1), 128)
    else:
        tile = max(128, min(batch_tile, _round_up(_cdiv(B, 2), 128)))
    B_pad = _round_up(B, tile)
    if B_pad != B:
        x = jnp.pad(x, ((0, 0), (0, B_pad - B)))
    grid = B_pad // tile

    def kernel(x_ref, slab_ref, out_ref):
        # Raw state rows 8..15 (selection / 32-x[12] fix-up folded into w1T/b1).
        xb = x_ref[...]                                              # (8, TB)

        w1T  = slab_ref[off['w1T']:off['w1T'] + d_model, 0:8]
        b1   = slab_ref[off['b1']:off['b1'] + d_model, 0:1]
        w2T  = slab_ref[off['w2T']:off['w2T'] + d_model, 0:d_model]
        b2   = slab_ref[off['b2']:off['b2'] + d_model, 0:1]
        wh1T = slab_ref[off['wh1T']:off['wh1T'] + 2 * hidden, 0:d_model]
        bh1  = slab_ref[off['bh1']:off['bh1'] + 2 * hidden, 0:1]
        wh2T = slab_ref[off['wh2T']:off['wh2T'] + out_rows, 0:2 * hidden]
        bh2  = slab_ref[off['bh2']:off['bh2'] + out_rows, 0:1]

        # Feature-major (batch on lanes) throughout: every vreg is lane-dense.
        h = jnp.dot(w1T, xb, preferred_element_type=jnp.float32) + b1
        h = jnp.maximum(h, 0.0)                                      # (d, TB)
        h = jnp.dot(w2T, h, preferred_element_type=jnp.float32) + b2
        h = jnp.maximum(h, 0.0)                                      # (d, TB)

        y1 = jnp.dot(wh1T, h, preferred_element_type=jnp.float32) + bh1
        y1 = jnp.maximum(y1, 0.0)                                    # (2h, TB)

        # Head-2 matmul with the dueling combine folded in; rows A..out_rows-1
        # of wh2T/bh2 are zero, giving a lane-dense (out_rows, TB) store.
        out_ref[...] = jnp.dot(wh2T, y1, preferred_element_type=jnp.float32) + bh2

    out = pl.pallas_call(
        kernel,
        out_shape=jax.ShapeDtypeStruct((out_rows, B_pad), jnp.float32),
        grid=(grid,),
        in_specs=[
            # Only the 8-row block containing rows 9..13 is DMA'd per step.
            pl.BlockSpec((8, tile), lambda i: (1, i)),
            # Constant index_map -> slab DMA'd once per call, stays resident.
            pl.BlockSpec((meta['rows'], meta['cols']), lambda i: (0, 0)),
        ],
        out_specs=pl.BlockSpec((out_rows, tile), lambda i: (0, i)),
        compiler_params=pltpu.CompilerParams(
            dimension_semantics=("parallel",)),
    )(x, slab)

    # Strip padding and return the module's (B, A) layout.
    return {'rl': out[:A, :B].T}


def rl_forward_ref(x, params):
    """Pure-JAX reference mirroring the original (unfused) PyTorch forward."""
    x = x.astype(jnp.float32)
    feat = jnp.stack([x[9], 32.0 - x[12], x[13]], axis=1)
    relu = lambda t: jnp.maximum(t, 0.0)
    h = relu(feat @ params['w1'] + params['b1'])
    h = relu(h @ params['w2'] + params['b2'])
    ad = relu(h @ params['wa1'] + params['ba1']) @ params['wa2'] + params['ba2']
    val = relu(h @ params['wv1'] + params['bv1']) @ params['wv2'] + params['bv2']
    return {'rl': val + ad - jnp.mean(ad, axis=1, keepdims=True)}


if __name__ == "__main__":
    key = jax.random.PRNGKey(0)
    k_x, k_x2, k_x3, k_p = jax.random.split(key, 4)

    N_STATES, B, OUTPUTS, D_MODEL = 16, 8, 4, 32
    params = init_params(k_p, d_model=D_MODEL, outputs=OUTPUTS)
    slab, meta = pack_params(params)

    # small batch (padded to one 128-lane tile)
    x = jax.random.uniform(k_x, (N_STATES, B), jnp.float32, 0.0, 32.0)
    out = rl_forward(x, slab, meta)
    jax.block_until_ready(out['rl'])
    ref = rl_forward_ref(x, params)
    assert out['rl'].shape == (B, OUTPUTS)
    assert jnp.allclose(out['rl'], ref['rl'], atol=1e-3, rtol=1e-3)

    # large batch, multiple "parallel" grid steps
    B2 = 512
    x2 = jax.random.uniform(k_x2, (N_STATES, B2), jnp.float32, 0.0, 32.0)
    out2 = rl_forward(x2, slab, meta)
    jax.block_until_ready(out2['rl'])
    ref2 = rl_forward_ref(x2, params)
    assert out2['rl'].shape == (B2, OUTPUTS)
    assert jnp.allclose(out2['rl'], ref2['rl'], atol=1e-3, rtol=1e-3)

    # large batch that is NOT a multiple of the tile (exercises the padded grid)
    B3 = 700
    x3 = jax.random.uniform(k_x3, (N_STATES, B3), jnp.float32, 0.0, 32.0)
    out3 = rl_forward(x3, slab, meta)
    jax.block_until_ready(out3['rl'])
    ref3 = rl_forward_ref(x3, params)
    assert out3['rl'].shape == (B3, OUTPUTS)
    assert jnp.allclose(out3['rl'], ref3['rl'], atol=1e-3, rtol=1e-3)

    print("KERNEL_OK")
</pallas_src>

<mosaic_0001>
module attributes {stable_mosaic.version = 11 : i64} {
  func.func @kernel(%arg0: i32, %arg1: memref<8x128xf32, #tpu.memory_space<vmem>>, %arg2: memref<208x32xf32, #tpu.memory_space<vmem>>, %arg3: memref<8x128xf32, #tpu.memory_space<vmem>>) attributes {dimension_semantics = [#tpu.dimension_semantics<parallel>], iteration_bounds = array<i64: 1>, scalar_prefetch = 0 : i64, scratch_operands = 0 : i64, tpu.core_type = #tpu.core_type<tc>, window_params = [{transform_indices = @transform_0, window_bounds = array<i64: 8, 128>}, {pipeline_mode = #tpu.pipeline_mode<synchronous>, transform_indices = @transform_1, window_bounds = array<i64: 208, 32>}, {transform_indices = @transform_2, window_bounds = array<i64: 8, 128>}]} {
    %c0 = arith.constant 0 : index
    %c0_0 = arith.constant 0 : index
    %0 = vector.load %arg1[%c0, %c0_0] : memref<8x128xf32, #tpu.memory_space<vmem>>, vector<8x128xf32>
    %c0_1 = arith.constant 0 : index
    %c0_2 = arith.constant 0 : index
    %1 = vector.load %arg2[%c0_1, %c0_2] : memref<208x32xf32, #tpu.memory_space<vmem>>, vector<32x8xf32>
    %c32 = arith.constant 32 : index
    %c0_3 = arith.constant 0 : index
    %2 = vector.load %arg2[%c32, %c0_3] : memref<208x32xf32, #tpu.memory_space<vmem>>, vector<32x1xf32>
    %c64 = arith.constant 64 : index
    %c0_4 = arith.constant 0 : index
    %3 = vector.load %arg2[%c64, %c0_4] : memref<208x32xf32, #tpu.memory_space<vmem>>, vector<32x32xf32>
    %c96 = arith.constant 96 : index
    %c0_5 = arith.constant 0 : index
    %4 = vector.load %arg2[%c96, %c0_5] : memref<208x32xf32, #tpu.memory_space<vmem>>, vector<32x1xf32>
    %c128 = arith.constant 128 : index
    %c0_6 = arith.constant 0 : index
    %5 = vector.load %arg2[%c128, %c0_6] : memref<208x32xf32, #tpu.memory_space<vmem>>, vector<32x32xf32>
    %c160 = arith.constant 160 : index
    %c0_7 = arith.constant 0 : index
    %6 = vector.load %arg2[%c160, %c0_7] : memref<208x32xf32, #tpu.memory_space<vmem>>, vector<32x1xf32>
    %c192 = arith.constant 192 : index
    %c0_8 = arith.constant 0 : index
    %7 = vector.load %arg2[%c192, %c0_8] : memref<208x32xf32, #tpu.memory_space<vmem>>, vector<8x32xf32>
    %c200 = arith.constant 200 : index
    %c0_9 = arith.constant 0 : index
    %8 = vector.load %arg2[%c200, %c0_9] : memref<208x32xf32, #tpu.memory_space<vmem>>, vector<8x1xf32>
    %cst = arith.constant dense<0.000000e+00> : vector<32x128xf32>
    %9 = tpu.matmul %1, %0, %cst {dimension_numbers = #tpu.dot_dimension_numbers<[1], [0], [0], [1], [0, 0, 1, 1], [], []>} : vector<32x8xf32>, vector<8x128xf32>, vector<32x128xf32> -> vector<32x128xf32>
    %10 = vector.broadcast %2 : vector<32x1xf32> to vector<32x128xf32>
    %11 = arith.addf %9, %10 : vector<32x128xf32>
    %cst_10 = arith.constant 0.000000e+00 : f32
    %12 = vector.broadcast %cst_10 : f32 to vector<32x128xf32>
    %13 = arith.maximumf %11, %12 : vector<32x128xf32>
    %cst_11 = arith.constant dense<0.000000e+00> : vector<32x128xf32>
    %14 = tpu.matmul %3, %13, %cst_11 {dimension_numbers = #tpu.dot_dimension_numbers<[1], [0], [0], [1], [0, 0, 1, 1], [], []>} : vector<32x32xf32>, vector<32x128xf32>, vector<32x128xf32> -> vector<32x128xf32>
    %15 = vector.broadcast %4 : vector<32x1xf32> to vector<32x128xf32>
    %16 = arith.addf %14, %15 : vector<32x128xf32>
    %cst_12 = arith.constant 0.000000e+00 : f32
    %17 = vector.broadcast %cst_12 : f32 to vector<32x128xf32>
    %18 = arith.maximumf %16, %17 : vector<32x128xf32>
    %cst_13 = arith.constant dense<0.000000e+00> : vector<32x128xf32>
    %19 = tpu.matmul %5, %18, %cst_13 {dimension_numbers = #tpu.dot_dimension_numbers<[1], [0], [0], [1], [0, 0, 1, 1], [], []>} : vector<32x32xf32>, vector<32x128xf32>, vector<32x128xf32> -> vector<32x128xf32>
    %20 = vector.broadcast %6 : vector<32x1xf32> to vector<32x128xf32>
    %21 = arith.addf %19, %20 : vector<32x128xf32>
    %cst_14 = arith.constant 0.000000e+00 : f32
    %22 = vector.broadcast %cst_14 : f32 to vector<32x128xf32>
    %23 = arith.maximumf %21, %22 : vector<32x128xf32>
    %cst_15 = arith.constant dense<0.000000e+00> : vector<8x128xf32>
    %24 = tpu.matmul %7, %23, %cst_15 {dimension_numbers = #tpu.dot_dimension_numbers<[1], [0], [0], [1], [0, 0, 1, 1], [], []>} : vector<8x32xf32>, vector<32x128xf32>, vector<8x128xf32> -> vector<8x128xf32>
    %25 = vector.broadcast %8 : vector<8x1xf32> to vector<8x128xf32>
    %26 = arith.addf %24, %25 : vector<8x128xf32>
    %c0_16 = arith.constant 0 : index
    %c0_17 = arith.constant 0 : index
    %27 = vector.load %arg3[%c0_16, %c0_17] : memref<8x128xf32, #tpu.memory_space<vmem>>, vector<8x128xf32>
    tpu.vector_store %arg3[%c0_16, %c0_17], %26 {strides = array<i32>} : memref<8x128xf32, #tpu.memory_space<vmem>>, vector<8x128xf32>,
    return
  }
  func.func @transform_0(%arg0: i32) -> (i32, i32) {
    %c1_i32 = arith.constant 1 : i32
    %c0_i32 = arith.constant 0 : i32
    return %c1_i32, %arg0 : i32, i32
  }
  func.func @transform_1(%arg0: i32) -> (i32, i32) {
    %c0_i32 = arith.constant 0 : i32
    %c0_i32_0 = arith.constant 0 : i32
    %c0_i32_1 = arith.constant 0 : i32
    return %c0_i32, %c0_i32_0 : i32, i32
  }
  func.func @transform_2(%arg0: i32) -> (i32, i32) {
    %c0_i32 = arith.constant 0 : i32
    %c0_i32_0 = arith.constant 0 : i32
    return %c0_i32, %arg0 : i32, i32
  }
}

</mosaic_0001>

<bundles_post_ra>
// kernel: tpu_custom_call.1
= control target key start
LH: loop header
LB: loop body
LE: loop exit
PB: predicated region body
PF: predicated region fallthrough
CT: control target
= control target key end

     0   :  { %vm62_vm0 = vcmask 64512   ;;  %v337_v3 = vmov 0   ;;  %s451_s0 = inlined_call_operand.vmem [shape: f32[16,128], index: 0, kind: input, shape index: {}]   ;;  %s452_s1 = inlined_call_operand.vmem [shape: f32[208,32], index: 1, kind: input, shape index: {}]   ;;  %s453_s2 = inlined_call_operand.hbm [shape: f32[8,128], index: 2, kind: output, shape index: {}]  }
   0x1   :  { %v284_v0 = vld [vmem:[%s451_s0 + $0x8] sm:$0xff]  ;;  %v23_v1 = vld [vmem:[%s452_s1 + $0x38] sm:$0xff]  ;;  %v16_v2 = vld [vmem:[%s452_s1] sm:$0xff]  ;;  %308 = vset.pattern.permute.xlu0 %v337_v3  ;;  %309 = vset.pattern.permute.xlu1 %v337_v3 }
   0x2   :  { %90 = vmatpush.msra.mxu0 %v284_v0  ;;  %v21_v4 = vld [vmem:[%s452_s1 + $0x28] sm:$0xff]  ;;  %59 = vperm.xlu0 %308, %v23_v1  }
   0x3   :  { %285 = vmatmul.msk.f32.vlgmr.msra.gmra.mxu0 %vm62_vm0, %v16_v2  ;;  %310 = vset.pattern.permute.xlu2 %v337_v3 }
   0x4   :  { %49 = vperm.xlu1 %309, %v21_v4  }
   0x5   :  { %7 = vsyncpa [#allocation3], 0  ;;  %v22_v5 = vld [vmem:[%s452_s1 + $0x30] sm:$0xff]  ;;  %v17_v6 = vld [vmem:[%s452_s1 + $0x8] sm:$0xff]  ;;  %vm128_vm1 = vcmask 261120   ;;  %s338_s5 = smov [#allocation2]  }
   0x6   :  { %v20_v7 = vld [vmem:[%s452_s1 + $0x20] sm:$0xff]  ;;  %v29_v8 = vld [vmem:[%s452_s1 + $0x68] sm:$0xff]  ;;  %v18_v9 = vld [vmem:[%s452_s1 + $0x10] sm:$0xff]  ;;  %s273_s6 = sshll.u32 %s338_s5, 4  ;;  %s275_s9 = sshll.u32 %s453_s2, 4  ;;  %s274_s6 = int_to_ptr.vmem [resolvable:$true] %s273_s6  ;;  %s276_s9 = int_to_ptr.hbm [resolvable:$true] %s275_s9 }
   0x7   :  { %v28_v10 = vld [vmem:[%s452_s1 + $0x60] sm:$0xff]  ;;  %v38_v11 = vld [vmem:[%s452_s1 + $0xb0] sm:$0xff]  ;;  %v19_v12 = vld [vmem:[%s452_s1 + $0x18] sm:$0xff] }
   0x8   :  { %v37_v13 = vld [vmem:[%s452_s1 + $0xa8] sm:$0xff]  ;;  %v31_v20 = vld [vmem:[%s452_s1 + $0x78] sm:$0xff]  ;;  %v30_v28 = vld [vmem:[%s452_s1 + $0x70] sm:$0xff] }
   0x9   :  { %v41_v14 = vld [vmem:[%s452_s1 + $0xc8] sm:$0xff]  ;;  %125 = vperm.xlu2 %310, %v31_v20   ;;  %v24_v33 = vld [vmem:[%s452_s1 + $0x40] sm:$0xff]  ;;  %v27_v34 = vld [vmem:[%s452_s1 + $0x58] sm:$0xff] }
   0xa   :  { %54 = vperm.xlu0 %308, %v22_v5   ;;  %v39_v35 = vld [vmem:[%s452_s1 + $0xb8] sm:$0xff]  ;;  %v25_v36 = vld [vmem:[%s452_s1 + $0x48] sm:$0xff]  ;;  %v36_v37 = vld [vmem:[%s452_s1 + $0xa0] sm:$0xff] }
   0xb   :  { %286 = vmatmul.msk.f32.gmra.mxu0 %vm62_vm0, %v17_v6  ;;  %v26_v38 = vld [vmem:[%s452_s1 + $0x50] sm:$0xff]  ;;  %v32_v55 = vld [vmem:[%s452_s1 + $0x80] sm:$0xff]  ;;  %v35_v56 = vld [vmem:[%s452_s1 + $0x98] sm:$0xff] }
   0xc   :  { %44 = vperm.xlu1 %309, %v20_v7   ;;  %v33_v57 = vld [vmem:[%s452_s1 + $0x88] sm:$0xff]  ;;  %v34_v58 = vld [vmem:[%s452_s1 + $0x90] sm:$0xff] }
  0x11   :  { %120 = vperm.xlu2 %310, %v30_v28  }
  0x12   :  { %115 = vperm.xlu0 %308, %v29_v8  }
  0x13   :  { %287 = vmatmul.msk.f32.gmra.mxu0 %vm62_vm0, %v18_v9 }
  0x14   :  { %110 = vperm.xlu1 %309, %v28_v10  }
  0x19   :  { %191 = vperm.xlu2 %310, %v39_v35  }
  0x1a   :  { %186 = vperm.xlu0 %308, %v38_v11   ;;  %v40_v11 = vld [vmem:[%s452_s1 + $0xc0] sm:$0xff] }
  0x1b   :  { %288 = vmatmul.msk.f32.gmra.mxu0 %vm62_vm0, %v19_v12 }
  0x1c   :  { %181 = vperm.xlu1 %309, %v37_v13  }
  0x21   :  { %176 = vperm.xlu2 %310, %v36_v37  }
  0x22   :  { %241 = vperm.xlu0 %308, %v41_v14  }
  0x63   :  { %v126_v40 = vpop.permute.xlu2 %125 }
  0x6b   :  { %v121_v46 = vpop.permute.xlu2 %120 }
  0x73   :  { %v192_v59 = vpop.permute.xlu2 %191 }
  0x74   :  { %v60_v17 = vpop.permute.xlu0 %59 }
  0x76   :  { %v50_v18 = vpop.permute.xlu1 %49 }
  0x7b   :  { %v177_v6 = vpop.permute.xlu2 %176 }
  0x7c   :  { %v55_v21 = vpop.permute.xlu0 %54 }
  0x7e   :  { %v45_v25 = vpop.permute.xlu1 %44 }
  0x80   :  { %v92_v15 = vpop.f32.mrf.mxu0 }
  0x81   :  { %v93_v29 = vadd.f32 %v92_v15, %v45_v25 }
  0x83   :  { %v104_v32 = vmax.f32 %v93_v29, 0.0 }
  0x84   :  { %v116_v45 = vpop.permute.xlu0 %115 }
  0x86   :  { %v111_v50 = vpop.permute.xlu1 %110 }
  0x88   :  { %v95_v16 = vpop.f32.mrf.mxu0 }
  0x89   :  { %v96_v26 = vadd.f32 %v95_v16, %v50_v18 }
  0x8b   :  { %v105_v31 = vmax.f32 %v96_v26, 0.0 }
  0x8c   :  { %v187_v1 = vpop.permute.xlu0 %186 }
  0x8e   :  { %v182_v2 = vpop.permute.xlu1 %181 }
  0x90   :  { %v98_v19 = vpop.f32.mrf.mxu0 }
  0x91   :  { %v99_v23 = vadd.f32 %v98_v19, %v55_v21 }
  0x93   :  { %v106_v30 = vmax.f32 %v99_v23, 0.0 }
  0x94   :  { %v242_v12 = vpop.permute.xlu0 %241 }
  0x98   :  { %v101_v22 = vpop.f32.mrf.mxu0 }
  0x99   :  { %v102_v24 = vadd.f32 %v101_v22, %v60_v17 }
  0x9b   :  { %v107_v27 = vmax.f32 %v102_v24, 0.0 }
  0x9d   :  { %153 = vmatpush.msra.mxu1 %v107_v27  ;;  %298 = vmatpush.msra.mxu3 %v107_v27 }
  0x9f   :  { %154 = vmatpush.msra.mxu1 %v106_v30  ;;  %299 = vmatpush.msra.mxu3 %v106_v30 }
  0xa1   :  { %155 = vmatpush.msra.mxu1 %v105_v31  ;;  %300 = vmatpush.msra.mxu3 %v105_v31 }
  0xa3   :  { %156 = vmatpush.msra.mxu1 %v104_v32  ;;  %301 = vmatpush.msra.mxu3 %v104_v32 }
  0xa4   :  { %289 = vmatmul.msk.f32.vlgmr.msra.gmra.mxu1 %vm128_vm1, %v24_v33  ;;  %292 = vmatmul.msk.f32.vlgmr.msra.gmra.mxu3 %vm128_vm1, %v27_v34 }
  0xac   :  { %290 = vmatmul.msk.f32.gmra.mxu1 %vm128_vm1, %v25_v36 }
  0xb4   :  { %291 = vmatmul.msk.f32.gmra.mxu1 %vm128_vm1, %v26_v38 }
 0x121   :  { %v158_v39 = vpop.f32.mrf.mxu1 }
 0x122   :  { %v159_v51 = vadd.f32 %v158_v39, %v111_v50 }
 0x124   :  { %v170_v54 = vmax.f32 %v159_v51, 0.0 }
 0x127   :  { %v167_v41 = vpop.f32.mrf.mxu3 }
 0x128   :  { %v168_v42 = vadd.f32 %v167_v41, %v126_v40 }
 0x129   :  { %v161_v43 = vpop.f32.mrf.mxu1 }
 0x12a   :  { %v173_v44 = vmax.f32 %v168_v42, 0.0  ;;  %v162_v48 = vadd.f32 %v161_v43, %v116_v45 }
 0x12c   :  { %218 = vmatpush.msra.mxu2 %v173_v44  ;;  %302 = vmatpush.msrb.mxu3 %v173_v44  ;;  %v171_v53 = vmax.f32 %v162_v48, 0.0 }
 0x131   :  { %v164_v47 = vpop.f32.mrf.mxu1 }
 0x132   :  { %v165_v49 = vadd.f32 %v164_v47, %v121_v46 }
 0x134   :  { %v172_v52 = vmax.f32 %v165_v49, 0.0 }
 0x136   :  { %219 = vmatpush.msra.mxu2 %v172_v52  ;;  %303 = vmatpush.msrb.mxu3 %v172_v52 }
 0x138   :  { %220 = vmatpush.msra.mxu2 %v171_v53  ;;  %304 = vmatpush.msrb.mxu3 %v171_v53 }
 0x13a   :  { %221 = vmatpush.msra.mxu2 %v170_v54  ;;  %305 = vmatpush.msrb.mxu3 %v170_v54 }
 0x13b   :  { %293 = vmatmul.msk.f32.vlgmr.msra.gmra.mxu2 %vm128_vm1, %v32_v55  ;;  %296 = vmatmul.msk.f32.vlgmr.msrb.gmra.mxu3 %vm128_vm1, %v35_v56 }
 0x143   :  { %294 = vmatmul.msk.f32.gmra.mxu2 %vm128_vm1, %v33_v57 }
 0x14b   :  { %295 = vmatmul.msk.f32.gmra.mxu2 %vm128_vm1, %v34_v58 }
 0x1be   :  { %v223_v60 = vpop.f32.mrf.mxu2  ;;  %v232_v61 = vpop.f32.mrf.mxu3 }
 0x1bf   :  { %v233_v62 = vadd.f32 %v232_v61, %v192_v59  ;;  %v224_v7 = vadd.f32 %v223_v60, %v177_v6 }
 0x1c1   :  { %v238_v63 = vmax.f32 %v233_v62, 0.0  ;;  %v235_v10 = vmax.f32 %v224_v7, 0.0 }
 0x1c3   :  { %259 = vmatpush.msra.mxu3 %v238_v63 }
 0x1c6   :  { %v226_v0 = vpop.f32.mrf.mxu2 }
 0x1c7   :  { %v227_v4 = vadd.f32 %v226_v0, %v182_v2 }
 0x1c9   :  { %v236_v9 = vmax.f32 %v227_v4, 0.0 }
 0x1ce   :  { %v229_v3 = vpop.f32.mrf.mxu2 }
 0x1cf   :  { %v230_v5 = vadd.f32 %v229_v3, %v187_v1 }
 0x1d1   :  { %v237_v8 = vmax.f32 %v230_v5, 0.0 }
 0x1d3   :  { %260 = vmatpush.msra.mxu3 %v237_v8 }
 0x1d5   :  { %261 = vmatpush.msra.mxu3 %v236_v9 }
 0x1d7   :  { %262 = vmatpush.msra.mxu3 %v235_v10 }
 0x1d8   :  { %297 = vmatmul.msk.f32.vlgmr.msra.gmra.mxu3 %vm128_vm1, %v40_v11 }
 0x25b   :  { %v264_v13 = vpop.f32.mrf.mxu3 }
 0x25c   :  { %v265_v14 = vadd.f32 %v264_v13, %v242_v12 }
 0x25e   :  { %267 = vst [vmem:[#allocation2] sm:$0xff] %v265_v14 }
 0x25f   :  { %278 = dma.vmem_to_hbm [thread:$0]  %s274_s6, 128, %s276_s9, [#allocation3]  }
 0x260   :  { %335 = dma.done.wait [#allocation3], 128  }
 0x261   :  { %336 = vsyncadd [#allocation3], 4294967168 }
 0x262   :  { %283 = vsyncpa [#allocation3], 1 }

</bundles_post_ra>
